<compile_context>
chip_gen: v5e
topology: v5e:2x2
jax: 0.10.0
libtpu: 0.0.40
codegen_flags: <defaults>
</compile_context>

<pallas_src>
import jax
import jax.numpy as jnp
from jax.experimental import pallas as pl
from jax.experimental.pallas import tpu as pltpu


# ----------------------------- Pallas kernel -------------------------------

def _edge_predictor_kernel(src_ref, xnew_ref, w1a_ref, w1b_ref, b1_ref,
                           w2_ref, b2_ref, o_ref):
    # fc1 on the implicit concat:  cat([src, xnew]) @ W1  ==  src @ W1a + xnew @ W1b
    h = jnp.dot(src_ref[...], w1a_ref[...], preferred_element_type=jnp.float32)
    h = h + jnp.dot(xnew_ref[...], w1b_ref[...], preferred_element_type=jnp.float32)
    h = jnp.maximum(h + b1_ref[...], 0.0)                       # ReLU

    # fc2: (H, 1) projection as a VPU multiply + cross-lane reduction
    # (avoids a 1-column MXU pass and a lane-sparse result).
    logit = jnp.sum(h * w2_ref[...], axis=-1, keepdims=True) + b2_ref[...]

    # sigmoid via EUP exp + divide (exact, matches the pure-JAX reference)
    prob = 1.0 / (1.0 + jnp.exp(-logit))                        # (B_pad, 1)

    # Lane-dense output slab: broadcast across 128 lanes -> unmasked full-vreg
    # stores; the wrapper slices column 0.
    o_ref[...] = jnp.broadcast_to(prob, o_ref.shape)


# ------------------------------ wrappers ------------------------------------

def prepare_params(fc1_weight, fc1_bias, fc2_weight, fc2_bias, in_channels):
    """One-time conversion from torch Linear layout to kernel layout (hoisted)."""
    return {
        # rows of W1 (math layout in_features x out_features) that multiply src_feature
        "w1a": jnp.asarray(fc1_weight[:, :in_channels].T, jnp.float32),
        # rows that multiply x_new
        "w1b": jnp.asarray(fc1_weight[:, in_channels:].T, jnp.float32),
        "b1": jnp.asarray(fc1_bias, jnp.float32).reshape(1, -1),
        # fc2.weight is (1, hidden): keep as a (1, hidden) row for the VPU reduction
        "w2_row": jnp.asarray(fc2_weight, jnp.float32).reshape(1, -1),
        "b2": jnp.asarray(fc2_bias, jnp.float32).reshape(1, 1),
    }


def edge_predictor_forward(params, src_feature, x_new):
    b = src_feature.shape[0]
    b_pad = ((b + 7) // 8) * 8                      # sublane-align the batch
    if b_pad != b:
        pad = ((0, b_pad - b), (0, 0))
        src_feature = jnp.pad(src_feature, pad)
        x_new = jnp.pad(x_new, pad)

    out = pl.pallas_call(
        _edge_predictor_kernel,
        out_shape=jax.ShapeDtypeStruct((b_pad, 128), jnp.float32),
        in_specs=[pl.BlockSpec(memory_space=pltpu.MemorySpace.VMEM)] * 7,
        out_specs=pl.BlockSpec(memory_space=pltpu.MemorySpace.VMEM),
    )(
        src_feature.astype(jnp.float32),
        x_new.astype(jnp.float32),
        params["w1a"], params["w1b"], params["b1"],
        params["w2_row"], params["b2"],
    )
    return out[:b, 0]                               # (B,)  == torch .squeeze()


def reference_forward(fc1_weight, fc1_bias, fc2_weight, fc2_bias, src_feature, x_new):
    cat = jnp.concatenate([src_feature, x_new], axis=1)
    h = jnp.maximum(cat @ fc1_weight.T + fc1_bias, 0.0)
    logit = h @ fc2_weight.T + fc2_bias
    return (1.0 / (1.0 + jnp.exp(-logit)))[:, 0]


# --------------------------------- main --------------------------------------

if __name__ == "__main__":
    IN_CHANNELS, HIDDEN, B = 32, 32, 8

    key = jax.random.PRNGKey(0)
    k_w1, k_b1, k_w2, k_b2, k_src, k_new = jax.random.split(key, 6)

    # deterministic "checkpoint" in torch Linear layout
    fc1_weight = jax.random.normal(k_w1, (HIDDEN, 2 * IN_CHANNELS), jnp.float32) * 0.1
    fc1_bias = jax.random.normal(k_b1, (HIDDEN,), jnp.float32) * 0.01
    fc2_weight = jax.random.normal(k_w2, (1, HIDDEN), jnp.float32) * 0.1
    fc2_bias = jax.random.normal(k_b2, (1,), jnp.float32) * 0.01

    params = prepare_params(fc1_weight, fc1_bias, fc2_weight, fc2_bias, IN_CHANNELS)

    # deterministic inputs
    src_feature = jax.random.normal(k_src, (B, IN_CHANNELS), jnp.float32)
    x_new = jax.random.normal(k_new, (B, IN_CHANNELS), jnp.float32)

    fwd = jax.jit(edge_predictor_forward)
    out = jax.block_until_ready(fwd(params, src_feature, x_new))

    ref = reference_forward(fc1_weight, fc1_bias, fc2_weight, fc2_bias,
                            src_feature, x_new)

    assert out.shape == (B,)
    assert jnp.allclose(out, ref, atol=1e-5, rtol=1e-5), (out, ref)

    print("KERNEL_OK")
</pallas_src>

<mosaic_0001>
module attributes {stable_mosaic.version = 11 : i64} {
  func.func @_edge_predictor_kernel(%arg0: memref<8x32xf32, #tpu.memory_space<vmem>>, %arg1: memref<8x32xf32, #tpu.memory_space<vmem>>, %arg2: memref<32x32xf32, #tpu.memory_space<vmem>>, %arg3: memref<32x32xf32, #tpu.memory_space<vmem>>, %arg4: memref<1x32xf32, #tpu.memory_space<vmem>>, %arg5: memref<1x32xf32, #tpu.memory_space<vmem>>, %arg6: memref<1x1xf32, #tpu.memory_space<vmem>>, %arg7: memref<8x128xf32, #tpu.memory_space<vmem>>) attributes {dimension_semantics = [], scalar_prefetch = 0 : i64, scratch_operands = 0 : i64, tpu.core_type = #tpu.core_type<tc>} {
    %c0 = arith.constant 0 : index
    %c0_0 = arith.constant 0 : index
    %0 = vector.load %arg0[%c0, %c0_0] : memref<8x32xf32, #tpu.memory_space<vmem>>, vector<8x32xf32>
    %c0_1 = arith.constant 0 : index
    %c0_2 = arith.constant 0 : index
    %1 = vector.load %arg2[%c0_1, %c0_2] : memref<32x32xf32, #tpu.memory_space<vmem>>, vector<32x32xf32>
    %cst = arith.constant dense<0.000000e+00> : vector<8x32xf32>
    %2 = tpu.matmul %0, %1, %cst {dimension_numbers = #tpu.dot_dimension_numbers<[1], [0], [0], [1], [0, 0, 1, 1], [], []>} : vector<8x32xf32>, vector<32x32xf32>, vector<8x32xf32> -> vector<8x32xf32>
    %c0_3 = arith.constant 0 : index
    %c0_4 = arith.constant 0 : index
    %3 = vector.load %arg1[%c0_3, %c0_4] : memref<8x32xf32, #tpu.memory_space<vmem>>, vector<8x32xf32>
    %c0_5 = arith.constant 0 : index
    %c0_6 = arith.constant 0 : index
    %4 = vector.load %arg3[%c0_5, %c0_6] : memref<32x32xf32, #tpu.memory_space<vmem>>, vector<32x32xf32>
    %cst_7 = arith.constant dense<0.000000e+00> : vector<8x32xf32>
    %5 = tpu.matmul %3, %4, %cst_7 {dimension_numbers = #tpu.dot_dimension_numbers<[1], [0], [0], [1], [0, 0, 1, 1], [], []>} : vector<8x32xf32>, vector<32x32xf32>, vector<8x32xf32> -> vector<8x32xf32>
    %6 = arith.addf %2, %5 : vector<8x32xf32>
    %c0_8 = arith.constant 0 : index
    %c0_9 = arith.constant 0 : index
    %7 = vector.load %arg4[%c0_8, %c0_9] : memref<1x32xf32, #tpu.memory_space<vmem>>, vector<1x32xf32>
    %8 = vector.broadcast %7 : vector<1x32xf32> to vector<8x32xf32>
    %9 = arith.addf %6, %8 : vector<8x32xf32>
    %cst_10 = arith.constant 0.000000e+00 : f32
    %10 = vector.broadcast %cst_10 : f32 to vector<8x32xf32>
    %11 = arith.maximumf %9, %10 : vector<8x32xf32>
    %c0_11 = arith.constant 0 : index
    %c0_12 = arith.constant 0 : index
    %12 = vector.load %arg5[%c0_11, %c0_12] : memref<1x32xf32, #tpu.memory_space<vmem>>, vector<1x32xf32>
    %13 = vector.broadcast %12 : vector<1x32xf32> to vector<8x32xf32>
    %14 = arith.mulf %11, %13 : vector<8x32xf32>
    %cst_13 = arith.constant dense<0.000000e+00> : vector<8xf32>
    %15 = vector.multi_reduction <add>, %14, %cst_13 [1] : vector<8x32xf32> to vector<8xf32>
    %16 = vector.shape_cast %15 : vector<8xf32> to vector<8x1xf32>
    %c0_14 = arith.constant 0 : index
    %c0_15 = arith.constant 0 : index
    %17 = vector.load %arg6[%c0_14, %c0_15] : memref<1x1xf32, #tpu.memory_space<vmem>>, vector<1x1xf32>
    %18 = vector.broadcast %17 : vector<1x1xf32> to vector<8x1xf32>
    %19 = arith.addf %16, %18 : vector<8x1xf32>
    %cst_16 = arith.constant 0.000000e+00 : f32
    %20 = vector.broadcast %cst_16 : f32 to vector<8x1xf32>
    %21 = arith.subf %20, %19 : vector<8x1xf32>
    %22 = math.exp %21 : vector<8x1xf32>
    %cst_17 = arith.constant 1.000000e+00 : f32
    %23 = vector.broadcast %cst_17 : f32 to vector<8x1xf32>
    %24 = arith.addf %23, %22 : vector<8x1xf32>
    %cst_18 = arith.constant 1.000000e+00 : f32
    %25 = vector.broadcast %cst_18 : f32 to vector<8x1xf32>
    %26 = arith.divf %25, %24 : vector<8x1xf32>
    %27 = vector.shape_cast %26 : vector<8x1xf32> to vector<8x1xf32>
    %28 = vector.broadcast %27 : vector<8x1xf32> to vector<8x128xf32>
    %c0_19 = arith.constant 0 : index
    %c0_20 = arith.constant 0 : index
    %29 = vector.load %arg7[%c0_19, %c0_20] : memref<8x128xf32, #tpu.memory_space<vmem>>, vector<8x128xf32>
    tpu.vector_store %arg7[%c0_19, %c0_20], %28 {strides = array<i32>} : memref<8x128xf32, #tpu.memory_space<vmem>>, vector<8x128xf32>,
    return
  }
}

</mosaic_0001>

<bundles_post_ra>
// kernel: edge_predictor_forward.1
= control target key start
LH: loop header
LB: loop body
LE: loop exit
PB: predicated region body
PF: predicated region fallthrough
CT: control target
= control target key end

     0   :  { %s385_s0 = inlined_call_operand.hbm [shape: f32[8,32], index: 0, kind: input, shape index: {}]   ;;  %s386_s1 = inlined_call_operand.hbm [shape: f32[8,32], index: 1, kind: input, shape index: {}]   ;;  %s387_s2 = inlined_call_operand.hbm [shape: f32[32,32], index: 2, kind: input, shape index: {}]   ;;  %s388_s3 = inlined_call_operand.hbm [shape: f32[32,32], index: 3, kind: input, shape index: {}]   ;;  %s389_s4 = inlined_call_operand.vmem [shape: f32[1,32], index: 4, kind: input, shape index: {}]   ;;  %s390_s5 = inlined_call_operand.vmem [shape: f32[1,32], index: 5, kind: input, shape index: {}]   ;;  %s391_s6 = inlined_call_operand.<no memory space> [shape: f32[1,1], index: 6, kind: input, shape index: {}]   ;;  %s392_s7 = inlined_call_operand.vmem [shape: f32[8,128], index: 7, kind: output, shape index: {}]  }
   0x1   :  { %v12_v0 = vstv %s391_s6 }
   0x2   :  { %13 = vst [vmem:[#allocation2] sm:$0x1] %v12_v0 }
   0x3   :  { %14 = vsyncpa [#allocation4], 0 }
   0x4   :  { %15 = vsyncpa [#allocation6], 0  ;;  %s33_s28 = sshll.u32 %s386_s1, 4  ;;  %s34_s28 = int_to_ptr.hbm [resolvable:$true] %s33_s28 }
   0x5   :  { %16 = vsyncpa [#allocation9], 0  ;;  %s314_s29 = smov [#allocation5]   ;;  %s22_s10 = sshll.u32 %s385_s0, 4  ;;  %s23_s10 = int_to_ptr.hbm [resolvable:$true] %s22_s10 }
   0x6   :  { %s35_s30 = sshll.u32 %s314_s29, 4  ;;  %s315_s11 = smov [#allocation3]   ;;  %s36_s30 = int_to_ptr.vmem [resolvable:$true] %s35_s30 }
   0x7   :  { %38 = dma.hbm_to_vmem [thread:$0]  %s34_s28, 128, %s36_s30, [#allocation6]  }
   0x8   :  { %s24_s6 = sshll.u32 %s315_s11, 4  ;;  %s43_s14 = sshll.u32 %s387_s2, 4  ;;  %s25_s6 = int_to_ptr.vmem [resolvable:$true] %s24_s6  ;;  %s44_s14 = int_to_ptr.hbm [resolvable:$true] %s43_s14 }
   0x9   :  { %27 = dma.hbm_to_vmem [thread:$0]  %s23_s10, 128, %s25_s6, [#allocation4]  }
   0xa   :  { %s316_s1 = smov [#allocation7]   ;;  %s56_s18 = sshll.u32 %s388_s3, 4  ;;  %s57_s18 = int_to_ptr.hbm [resolvable:$true] %s56_s18 }
   0xb   :  { %s45_s15 = sshll.u32 %s316_s1, 4  ;;  %s317_s19 = smov 128   ;;  %s46_s15 = int_to_ptr.vmem [resolvable:$true] %s45_s15 }
   0xc   :  { %s318_s0 = smov 8   ;;  %s319_s20 = smov [#allocation8]  }
   0xd   :  { %51 = dma.hbm_to_vmem [thread:$0]  %s44_s14, 512, %s46_s15, [#allocation6], %s317_s19, %s317_s19, %s318_s0  }
   0xe   :  { %s58_s21 = sshll.u32 %s319_s20, 4  ;;  %s59_s21 = int_to_ptr.vmem [resolvable:$true] %s58_s21 }
   0xf   :  { %64 = dma.hbm_to_vmem [thread:$0]  %s57_s18, 512, %s59_s21, [#allocation9], %s317_s19, %s317_s19, %s318_s0  }
  0x10   :  { %308 = dma.done.wait [#allocation4], 128  }
  0x11   :  { %309 = vsyncadd [#allocation4], 4294967168 }
  0x12   :  { %310 = dma.done.wait [#allocation6], 640  }
  0x13   :  { %311 = vsyncadd [#allocation6], 4294966656 }
  0x14   :  { %312 = dma.done.wait [#allocation9], 512  }
  0x15   :  { %313 = vsyncadd [#allocation9], 4294966784  ;;  %v96_v1 = vld [vmem:[#allocation8 + $0x18] sm:$0xff]  ;;  %v95_v3 = vld [vmem:[#allocation8 + $0x10] sm:$0xff]  ;;  %vm97_vm0 = vcmask 261120   ;;  %v320_v20 = vmov 0  }
  0x16   :  { %v91_v2 = vld [vmem:[#allocation7 + $0x18] sm:$0xff]  ;;  %113 = vmatpush.msra.mxu0 %v96_v1  ;;  %v90_v4 = vld [vmem:[#allocation7 + $0x10] sm:$0xff]  ;;  %v94_v5 = vld [vmem:[#allocation8 + $0x8] sm:$0xff]  ;;  %204 = vset.pattern.permute.xlu0 %v320_v20 }
  0x17   :  { %136 = vmatpush.msra.mxu1 %v91_v2  ;;  %v89_v6 = vld [vmem:[#allocation7 + $0x8] sm:$0xff]  ;;  %v93_v7 = vld [vmem:[#allocation8] sm:$0xff]  ;;  %v92_v9 = vld [vmem:[#allocation5] sm:$0xff] }
  0x18   :  { %114 = vmatpush.msra.mxu0 %v95_v3  ;;  %v88_v8 = vld [vmem:[#allocation7] sm:$0xff]  ;;  %v87_v10 = vld [vmem:[#allocation3] sm:$0xff]  ;;  %v205_v11 = vld [vmem:[%s389_s4] ss:$0 sm:$0xff] }
  0x19   :  { %137 = vmatpush.msra.mxu1 %v90_v4  ;;  %v206_v16 = vld [vmem:[%s390_s5] ss:$0 sm:$0xff] }
  0x1a   :  { %115 = vmatpush.msra.mxu0 %v94_v5  ;;  %v207_v21 = vld [vmem:[#allocation2] ss:$0 sm:$0xff] }
  0x1b   :  { %138 = vmatpush.msra.mxu1 %v89_v6 }
  0x1c   :  { %116 = vmatpush.msra.mxu0 %v93_v7 }
  0x1d   :  { %139 = vmatpush.msra.mxu1 %v88_v8  ;;  %195 = vmatmul.msk.f32.vlgmr.msra.gmra.mxu0 %vm97_vm0, %v92_v9 }
  0x1e   :  { %196 = vmatmul.msk.f32.vlgmr.msra.gmra.mxu1 %vm97_vm0, %v87_v10 }
  0x9a   :  { %v118_v12 = vpop.f32.mrf.mxu0 }
  0x9b   :  { %v141_v13 = vpop.f32.mrf.mxu1 }
  0x9c   :  { %v142_v14 = vadd.f32 %v141_v13, %v118_v12 }
  0x9e   :  { %v148_v15 = vadd.f32 %v205_v11, %v142_v14 }
  0xa0   :  { %v149_v17 = vmax.f32 %v148_v15, 0.0 }
  0xa2   :  { %v154_v18 = vmul.f32 %v206_v16, %v149_v17 }
  0xa4   :  { %v155_v19 = vsel %vm97_vm0, %v154_v18, 0.0 }
  0xa5   :  { %156 = vadd.xlane.f32.xlu0 %v155_v19 }
 0x118   :  { %v157_v22 = vpop.xlane.xlu0 %156 }
 0x119   :  { %v162_v23 = vadd.f32 %v207_v21, %v157_v22 }
 0x11b   :  { %v163_v24 = vsub.f32 0.0, %v162_v23 }
 0x11d   :  { %v164_v25 = vmul.f32 1.442695, %v163_v24 }
 0x11f   :  { %208 = vpow2.f32 %v164_v25 }
 0x125   :  { %v209_v26 = vpop.eup %208 }
 0x126   :  { %v166_v27 = vadd.f32 1.0, %v209_v26 }
 0x128   :  { %210 = vrcp.f32 %v166_v27  ;;  %v178_v31 = vand.u32 2147483648, %v166_v27  ;;  %v176_v33 = vand.u32 2147483647, %v166_v27  ;;  %vm172_vm2 = vweird.f32 %v166_v27 }
 0x12a   :  { %v179_v35 = vor.u32 1.1754944e-38, %v178_v31  ;;  %vm177_vm4 = vcmp.eq.f32.partialorder %v176_v33, 8.507059e+37 }
 0x12e   :  { %v211_v28 = vpop.eup %210 }
 0x12f   :  { %v168_v29 = vmul.f32 %v211_v28, %v166_v27  ;;  %vm173_vm1 = vweird.f32 %v211_v28 }
 0x130   :  { %vm174_vm3 = vmor %vm172_vm2, %vm173_vm1 }
 0x131   :  { %v169_v30 = vsub.f32 1.0, %v168_v29 }
 0x133   :  { %v170_v32 = vmul.f32 %v211_v28, %v169_v30 }
 0x135   :  { %v171_v34 = vadd.f32 %v211_v28, %v170_v32 }
 0x137   :  { %v175_v36 = vsel %vm174_vm3, %v211_v28, %v171_v34 }
 0x138   :  { %v180_v37 = vsel %vm177_vm4, %v179_v35, %v175_v36 }
 0x139   :  { %184 = vperm.xlu0 %204, %v180_v37  }
 0x1ab   :  { %v185_v38 = vpop.permute.xlu0 %184 }
 0x1ac   :  { %187 = vst [vmem:[%s392_s7] sm:$0xff] %v185_v38 }
 0x1ad   :  { %192 = vsyncpa [#allocation4], 1 }
 0x1ae   :  { %193 = vsyncpa [#allocation6], 1 }
 0x1af   :  { %194 = vsyncpa [#allocation9], 1 }

</bundles_post_ra>
